<compile_context>
chip_gen: v5e
topology: v5e:2x2
jax: 0.10.0
libtpu: 0.0.40
codegen_flags: <defaults>
</compile_context>

<pallas_src>
import jax
import jax.numpy as jnp
from jax.experimental import pallas as pl
from jax.experimental.pallas import tpu as pltpu


def _residual_small_c_kernel(x_ref, w_ref, b_ref, o_ref):
    # VPU path for small C: a CxC contraction would leave the MXU ~idle, so do
    # C unrolled rank-1 broadcast-FMAs on lane-dense (C, T) data instead.
    # x_ref/o_ref: (1, C, T) VMEM ; w_ref: (C, C) VMEM ; b_ref: (C, 1) VMEM
    x = x_ref[0].astype(jnp.float32)                 # (C, T)
    w = w_ref[...].astype(jnp.float32)               # (C_out, C_in)
    y = x + b_ref[...].astype(jnp.float32)           # residual + bias
    c = x.shape[0]
    for i in range(c):                               # unrolled: C VPU FMAs
        y = y + w[:, i:i + 1] * x[i:i + 1, :]        # (C,1)*(1,T) -> (C,T)
    o_ref[0] = y.astype(o_ref.dtype)


def _residual_mxu_kernel(x_ref, w_ref, b_ref, o_ref):
    # MXU path for larger C: (C,C) @ (C,T) channel matmul + residual add.
    # x_ref/o_ref: (1, C, T) VMEM ; w_ref: (C, C) VMEM ; b_ref: (C, 1) VMEM
    x = x_ref[0]
    y = jnp.dot(w_ref[...], x, preferred_element_type=jnp.float32)
    y = y + b_ref[...].astype(jnp.float32) + x.astype(jnp.float32)
    o_ref[0] = y.astype(o_ref.dtype)


def residual_conv1x1(x_nchw, weight, bias):
    """fn(x) + x with fn = 1x1 conv.  x_nchw: (N, C, H, W)."""
    N, C, H, W = x_nchw.shape
    HW = H * W
    x3d = x_nchw.reshape(N, C, HW)          # free reshape: NCHW is already (N,C,HW)-contiguous
    b2d = bias.reshape(C, 1)

    # --- tile the HW (lane) axis; budget ~12 MiB for the 4 double-buffered
    #     activation tiles so it fits default scoped VMEM on v5e/v6e/v7x. ---
    act_budget = 12 * 1024 * 1024
    itemsize = jnp.dtype(x3d.dtype).itemsize
    t_cap = act_budget // (4 * C * itemsize)
    t_cap = max(128, (t_cap // 128) * 128)
    t_cap = min(t_cap, 4096)
    if HW <= t_cap:
        tile_hw = HW                        # full dim: always a legal block dim
    else:
        tile_hw = t_cap                     # multiple of 128; last tile padded by Pallas
    n_hw = pl.cdiv(HW, tile_hw)

    kernel = _residual_small_c_kernel if C <= 16 else _residual_mxu_kernel

    out3d = pl.pallas_call(
        kernel,
        out_shape=jax.ShapeDtypeStruct((N, C, HW), x3d.dtype),
        grid=(N, n_hw),
        in_specs=[
            pl.BlockSpec((1, C, tile_hw), lambda n, h: (n, 0, h)),
            pl.BlockSpec((C, C), lambda n, h: (0, 0)),
            pl.BlockSpec((C, 1), lambda n, h: (0, 0)),
        ],
        out_specs=pl.BlockSpec((1, C, tile_hw), lambda n, h: (n, 0, h)),
        input_output_aliases={0: 0},        # reuse x's HBM buffer for the output
        compiler_params=pltpu.CompilerParams(
            dimension_semantics=("parallel", "parallel"),
            vmem_limit_bytes=32 * 1024 * 1024,
        ),
    )(x3d, weight, b2d)

    return out3d.reshape(N, C, H, W)


if __name__ == "__main__":
    key = jax.random.PRNGKey(0)
    kx, kw, kb = jax.random.split(key, 3)

    N, C, H, W = 2, 4, 16, 16
    x = jax.random.normal(kx, (N, C, H, W), dtype=jnp.float32)
    # Deterministic "fn" parameters: 1x1 conv weight (C_out, C_in) and bias (C,)
    weight = jax.random.normal(kw, (C, C), dtype=jnp.float32) * 0.1
    bias = jax.random.normal(kb, (C,), dtype=jnp.float32) * 0.1

    # Plain-JAX reference: fn(x) + x  (1x1 conv == channel matmul)
    ref = jnp.einsum("oc,nchw->nohw", weight, x) + bias[None, :, None, None] + x
    ref = jax.block_until_ready(ref)

    out = residual_conv1x1(x, weight, bias)
    out = jax.block_until_ready(out)

    assert out.shape == (N, C, H, W)
    assert jnp.allclose(out, ref, atol=1e-5, rtol=1e-5)

    print("KERNEL_OK")
</pallas_src>

<mosaic_0001>
module attributes {stable_mosaic.version = 11 : i64} {
  func.func @_residual_small_c_kernel(%arg0: i32, %arg1: i32, %arg2: memref<1x4x256xf32, #tpu.memory_space<vmem>>, %arg3: memref<4x4xf32, #tpu.memory_space<vmem>>, %arg4: memref<4x1xf32, #tpu.memory_space<vmem>>, %arg5: memref<1x4x256xf32, #tpu.memory_space<vmem>>) attributes {dimension_semantics = [#tpu.dimension_semantics<parallel>, #tpu.dimension_semantics<parallel>], iteration_bounds = array<i64: 2, 1>, scalar_prefetch = 0 : i64, scratch_operands = 0 : i64, tpu.core_type = #tpu.core_type<tc>, window_params = [{transform_indices = @transform_0, window_bounds = array<i64: 1, 4, 256>}, {pipeline_mode = #tpu.pipeline_mode<synchronous>, transform_indices = @transform_1, window_bounds = array<i64: 4, 4>}, {pipeline_mode = #tpu.pipeline_mode<synchronous>, transform_indices = @transform_2, window_bounds = array<i64: 4, 1>}, {transform_indices = @transform_3, window_bounds = array<i64: 1, 4, 256>}]} {
    %c0 = arith.constant 0 : index
    %c0_0 = arith.constant 0 : index
    %c0_1 = arith.constant 0 : index
    %0 = vector.load %arg2[%c0, %c0_0, %c0_1] : memref<1x4x256xf32, #tpu.memory_space<vmem>>, vector<1x4x256xf32>
    %1 = vector.shape_cast %0 : vector<1x4x256xf32> to vector<4x256xf32>
    %c0_2 = arith.constant 0 : index
    %c0_3 = arith.constant 0 : index
    %2 = vector.load %arg3[%c0_2, %c0_3] : memref<4x4xf32, #tpu.memory_space<vmem>>, vector<4x4xf32>
    %c0_4 = arith.constant 0 : index
    %c0_5 = arith.constant 0 : index
    %3 = vector.load %arg4[%c0_4, %c0_5] : memref<4x1xf32, #tpu.memory_space<vmem>>, vector<4x1xf32>
    %4 = vector.broadcast %3 : vector<4x1xf32> to vector<4x256xf32>
    %5 = arith.addf %1, %4 : vector<4x256xf32>
    %6 = vector.extract_strided_slice %2 {offsets = [0, 0], sizes = [4, 1], strides = [1, 1]} : vector<4x4xf32> to vector<4x1xf32>
    %7 = vector.extract_strided_slice %1 {offsets = [0, 0], sizes = [1, 256], strides = [1, 1]} : vector<4x256xf32> to vector<1x256xf32>
    %8 = vector.broadcast %6 : vector<4x1xf32> to vector<4x256xf32>
    %9 = vector.broadcast %7 : vector<1x256xf32> to vector<4x256xf32>
    %10 = arith.mulf %8, %9 : vector<4x256xf32>
    %11 = arith.addf %5, %10 : vector<4x256xf32>
    %12 = vector.extract_strided_slice %2 {offsets = [0, 1], sizes = [4, 1], strides = [1, 1]} : vector<4x4xf32> to vector<4x1xf32>
    %13 = vector.extract_strided_slice %1 {offsets = [1, 0], sizes = [1, 256], strides = [1, 1]} : vector<4x256xf32> to vector<1x256xf32>
    %14 = vector.broadcast %12 : vector<4x1xf32> to vector<4x256xf32>
    %15 = vector.broadcast %13 : vector<1x256xf32> to vector<4x256xf32>
    %16 = arith.mulf %14, %15 : vector<4x256xf32>
    %17 = arith.addf %11, %16 : vector<4x256xf32>
    %18 = vector.extract_strided_slice %2 {offsets = [0, 2], sizes = [4, 1], strides = [1, 1]} : vector<4x4xf32> to vector<4x1xf32>
    %19 = vector.extract_strided_slice %1 {offsets = [2, 0], sizes = [1, 256], strides = [1, 1]} : vector<4x256xf32> to vector<1x256xf32>
    %20 = vector.broadcast %18 : vector<4x1xf32> to vector<4x256xf32>
    %21 = vector.broadcast %19 : vector<1x256xf32> to vector<4x256xf32>
    %22 = arith.mulf %20, %21 : vector<4x256xf32>
    %23 = arith.addf %17, %22 : vector<4x256xf32>
    %24 = vector.extract_strided_slice %2 {offsets = [0, 3], sizes = [4, 1], strides = [1, 1]} : vector<4x4xf32> to vector<4x1xf32>
    %25 = vector.extract_strided_slice %1 {offsets = [3, 0], sizes = [1, 256], strides = [1, 1]} : vector<4x256xf32> to vector<1x256xf32>
    %26 = vector.broadcast %24 : vector<4x1xf32> to vector<4x256xf32>
    %27 = vector.broadcast %25 : vector<1x256xf32> to vector<4x256xf32>
    %28 = arith.mulf %26, %27 : vector<4x256xf32>
    %29 = arith.addf %23, %28 : vector<4x256xf32>
    %c0_6 = arith.constant 0 : index
    %c0_7 = arith.constant 0 : index
    %c0_8 = arith.constant 0 : index
    %30 = vector.load %arg5[%c0_6, %c0_7, %c0_8] : memref<1x4x256xf32, #tpu.memory_space<vmem>>, vector<1x4x256xf32>
    %31 = vector.shape_cast %30 : vector<1x4x256xf32> to vector<4x256xf32>
    %32 = vector.shape_cast %29 : vector<4x256xf32> to vector<1x4x256xf32>
    tpu.vector_store %arg5[%c0_6, %c0_7, %c0_8], %32 {strides = array<i32>} : memref<1x4x256xf32, #tpu.memory_space<vmem>>, vector<1x4x256xf32>,
    return
  }
  func.func @transform_0(%arg0: i32, %arg1: i32) -> (i32, i32, i32) {
    %c0_i32 = arith.constant 0 : i32
    %c0_i32_0 = arith.constant 0 : i32
    return %arg0, %c0_i32, %arg1 : i32, i32, i32
  }
  func.func @transform_1(%arg0: i32, %arg1: i32) -> (i32, i32) {
    %c0_i32 = arith.constant 0 : i32
    %c0_i32_0 = arith.constant 0 : i32
    %c0_i32_1 = arith.constant 0 : i32
    return %c0_i32, %c0_i32_0 : i32, i32
  }
  func.func @transform_2(%arg0: i32, %arg1: i32) -> (i32, i32) {
    %c0_i32 = arith.constant 0 : i32
    %c0_i32_0 = arith.constant 0 : i32
    %c0_i32_1 = arith.constant 0 : i32
    return %c0_i32, %c0_i32_0 : i32, i32
  }
  func.func @transform_3(%arg0: i32, %arg1: i32) -> (i32, i32, i32) {
    %c0_i32 = arith.constant 0 : i32
    %c0_i32_0 = arith.constant 0 : i32
    return %arg0, %c0_i32, %arg1 : i32, i32, i32
  }
}

</mosaic_0001>

<bundles_post_ra>
// kernel: tpu_custom_call.1
= control target key start
LH: loop header
LB: loop body
LE: loop exit
PB: predicated region body
PF: predicated region fallthrough
CT: control target
= control target key end

     0   :  { %8 = vsyncpa [#allocation3], 0  ;;  %s763_s0 = inlined_call_operand.hbm [shape: f32[2,4,256], index: 0, kind: input, shape index: {}, may-alias: {0,3}]   ;;  %s764_s1 = inlined_call_operand.vmem [shape: f32[4,4], index: 1, kind: input, shape index: {}]   ;;  %s765_s2 = inlined_call_operand.vmem [shape: f32[4,1], index: 2, kind: input, shape index: {}]   ;;  %s766_s3 = inlined_call_operand.hbm [shape: f32[2,4,256], index: 3, kind: output, shape index: {}, may-alias: {0,3}]  }
   0x1   :  { %10 = vsyncpa [#allocation3 + $0x1], 0 }
   0x2   :  { %11 = vsyncpa [#allocation4], 0 }
   0x3   :  { %13 = vsyncpa [#allocation4 + $0x1], 0  ;;  %s629_s12 = smov 0   ;;  %s631_s13 = smov 0  }
   0x4   :  { %s633_s14 = smov 0   ;;  %s635_s15 = smov 0  }
   0x5   :  { %s637_s16 = smov 0   ;;  %s639_s17 = smov 0  }
   0x6 LB: > { %s401_s18 = sadd.s32 4294967295, %s602_s17   ;;  %s402_s19 = sadd.s32 4294967294, %s602_s17   ;;  %s602_s17 = sphi %s639_s17, %s19_s17   ;;  %s598_s16 = sphi %s637_s16, %s775_s16   ;;  %s594_s15 = sphi %s635_s15, %s774_s15   ;;  %s590_s14 = sphi %s633_s14, %s773_s14   ;;  %s586_s13 = sphi %s631_s13, %s772_s13   ;;  %s582_s12 = sphi %s629_s12, %s771_s12  }
   0x7   : > { %s31_s20 = sadd.s32 1, %s598_s16  ;;  %s40_s21 = sadd.s32 1, %s590_s14 }
   0x8   : > { %p33_p0 = scmp.ge.s32.totalorder %s31_s20, 2  ;;  %p47_p1 = scmp.ne.s32.totalorder %s590_s14, %s586_s13 }
   0x9   : > { %p48_p2 = scmp.eq.s32.totalorder %s602_s17, 0  ;;  %p53_p3 = scmp.ne.s32.totalorder %s586_s13, %s582_s12 }
   0xa   : > { %s777_s20 = smov (%p33_p0, %s31_s20), 0  ;;  %p54_p5 = scmp.eq.s32.totalorder %s401_s18, 0 }
   0xb   : > { %p670_p4 = por %p48_p2, %p47_p1  ;;  %s35_s23 = ssub.s32 %s598_s16, %s777_s20 }
   0xc   : > { %p121_p6 = scmp.eq.s32.totalorder %s401_s18, 1  ;;  %p38_p7 = scmp.eq.s32.totalorder %s35_s23, 0 }
   0xd   : > { %p676_p8 = por %p54_p5, %p53_p3  ;;  %p127_p10 = scmp.eq.s32.totalorder %s402_s19, 1 }
   0xe   : > { %p680_p9 = por %p121_p6, %p47_p1  ;;  %p404_p12 = scmp.ge.s32.totalorder %s602_s17, 2 }
   0xf   : > { %s685_s26 = scalar_select %p38_p7, %s590_s14, %s40_s21  }
  0x10   : > { %p687_p11 = por %p127_p10, %p53_p3  ;;  %p430_p13 = scmp.lt.s32.totalorder %s602_s17, 2 }
  0x11   : > { %s153_s28 = sand.u32 1, %s590_s14   ;;  %s416_s30 = sshll.u32 %s598_s16, 3 }
  0x12   : > { %s405_s29 = sshll.u32 %s153_s28, 3  ;;  %s164_s6 = scalar_lea.hbm %s763_s0, %s416_s30 }
  0x13   : > { %s157_s7 = scalar_lea.vmem [#allocation2], %s405_s29  ;;  %s166_s9 = sshll.u32 %s164_s6, 4  ;;  %s167_s9 = int_to_ptr.hbm [resolvable:$true] %s166_s9 }
  0x14   : > { %s168_s8 = sshll.u32 %s157_s7, 4  ;;  %p423_p0 = pnand %p430_p13, %p670_p4  ;;  %s169_s8 = int_to_ptr.vmem [resolvable:$true] %s168_s8 }
  0x15   : > { %p408_p1 = scmp.ge.s32.totalorder %s602_s17, 1  ;;  %p173_p2 = scmp.lt.s32.totalorder %s602_s17, 3 }
  0x16   : > { %s154_s10 = scalar_lea.sflag [#allocation3], %s153_s28 }
  0x17   : > { %425 = dma.hbm_to_vmem [thread:$0]  (!%p423_p0), %s167_s9, 128, %s169_s8, %s154_s10  }
  0x18   : > { %p174_p3 = pnand %p408_p1, %p173_p2 }
  0x19   : > { %s703_s11 = sand.u32 (!%p174_p3), 1, %s586_s13  }
  0x1a   : > { %177 = sbr.rel (%p174_p3) target bundleno = 173 (0xad), region = 32  ;;  %s409_s18 = sshll.u32 (!%p174_p3), %s703_s11, 3 }
  0x1b   : > { %s180_s19 = scalar_lea.sflag (!%p174_p3), [#allocation3], %s703_s11  ;;  %s183_s21 = scalar_lea.vmem (!%p174_p3), [#allocation2], %s409_s18 }
  0x1f   : > { %573 = dma.done.wait (%p676_p8), %s180_s19, 128  }
  0x20   : > { %575 = vsyncadd (%p676_p8), %s180_s19, 4294967168  ;;  %v604_v0 = vmov 1   ;;  %v605_v1 = vmov 0   ;;  %v606_v2 = vmov 3   ;;  %v210_v3 = vld [vmem:[%s764_s1] sm:$0xf] }
  0x21   : > { %486 = vset.pattern.permute.xlu1 %v604_v0  ;;  %485 = vset.pattern.permute.xlu0 %v605_v1  ;;  %v211_v4 = vld [vmem:[%s765_s2] sm:$0xf]  ;;  %v607_v5 = vmov 2   ;;  %v608_v12 = vmov 839922192   ;;  %vm239_vm0 = vcmask 1043456  }
  0x22   : > { %488 = vset.pattern.permute.xlu2 %v606_v2  ;;  %244 = vperm.xlu1 %486, %v210_v3   ;;  %v209_v6 = vld [vmem:[%s183_s21] sm:$0xff]  ;;  %v217_v13 = vunpack.c.l.s4 %v608_v12  ;;  %s417_s24 = sshll.u32 %s594_s15, 3  ;;  %s206_s15 = scalar_lea.vmem [#allocation5], %s409_s18 }
  0x23   : > { %224 = vperm.xlu0 %485, %v210_v3   ;;  %280 = vperm.xlu2 %488, %v210_v3   ;;  %v229_v7 = vperm.slane %v209_v6, 4  ;;  %v248_v8 = vperm.slane %v209_v6, 5  ;;  %v284_v14 = vperm.slane %v209_v6, 7  ;;  %v247_v15 = vperm.slane %v209_v6, 1  ;;  %s312_s5 = scalar_lea.hbm %s766_s3, %s417_s24  ;;  %s314_s6 = sshll.u32 %s206_s15, 4  ;;  %s315_s6 = int_to_ptr.vmem [resolvable:$true] %s314_s6 }
  0x24   : > { %v228_v17 = vperm.slane %v209_v6, 0  ;;  %v266_v18 = vperm.slane %v209_v6, 6  ;;  %v265_v20 = vperm.slane %v209_v6, 2  ;;  %v218_v21 = vunpack.c.0.s8 %v217_v13  ;;  %s316_s7 = sshll.u32 %s312_s5, 4  ;;  %s299_s8 = scalar_lea.sflag [#allocation4], %s703_s11  ;;  %s317_s7 = int_to_ptr.hbm [resolvable:$true] %s316_s7 }
  0x25   : > { %v233_v11 = vperm.slane %v229_v7, 0  ;;  %v252_v16 = vperm.slane %v248_v8, 1  ;;  %v283_v22 = vperm.slane %v209_v6, 3  ;;  %v288_v23 = vperm.slane %v284_v14, 3  ;;  %s534_s9 = sshra.s32 %s317_s7, 4  ;;  %s540_s18 = scalar_lea.hbm %s766_s3, 16  ;;  %s535_s9 = int_to_ptr.hbm [resolvable:$true] %s534_s9 }
  0x26   : > { %v251_v24 = vperm.slane %v247_v15, 1  ;;  %v232_v26 = vperm.slane %v228_v17, 0  ;;  %v270_v27 = vperm.slane %v266_v18, 2  ;;  %v269_v31 = vperm.slane %v265_v20, 2  ;;  %s536_s10 = scalar_lea.hbm %s535_s9, 8  ;;  %p541_p7 = scmp.lt.s32.totalorder %s535_s9, %s766_s3 }
  0x27   : > { %v287_v34 = vperm.slane %v283_v22, 3  ;;  %p537_p4 = scmp.ne.s32.totalorder %s535_s9, %s536_s10  ;;  %p542_p8 = scmp.lt.s32.totalorder %s540_s18, %s536_s10 }
  0x29   : > { %p538_p5 = pnand %p537_p4, %p680_p9  ;;  %p543_p10 = por %p542_p8, %p541_p7 }
  0x2a   : > { %487 = vset.pattern.permute.xlu1 %v607_v5 }
  0x2b   : > { %214 = vperm.xlu0 %485, %v211_v4   ;;  %262 = vperm.xlu1 %487, %v210_v3   ;;  %p539_p6 = pneg %p538_p5 }
  0x2d   : > { %p544_p13 = pnand %p543_p10, %p539_p6 }
  0x33   : > { %489 = vset.pattern.permute.xlu0 %v606_v2 }
  0x7d   : > { %v281_v28 = vpop.permute.xlu2 %280 }
  0x7e   : > { %v290_v35 = vmul.f32 %v288_v23, %v281_v28  ;;  %v289_v46 = vmul.f32 %v287_v34, %v281_v28 }
  0x80   : > { %v293_v47 = vrot.slane %v290_v35, 4 }
  0x82   : > { %v294_v51 = vsel %vm239_vm0, %v289_v46, %v293_v47 }
  0x94   : > { %v245_v9 = vpop.permute.xlu1 %244 }
  0x95   : > { %v225_v10 = vpop.permute.xlu0 %224  ;;  %v254_v25 = vmul.f32 %v252_v16, %v245_v9  ;;  %v253_v36 = vmul.f32 %v251_v24, %v245_v9 }
  0x96   : > { %v235_v19 = vmul.f32 %v233_v11, %v225_v10  ;;  %v234_v38 = vmul.f32 %v232_v26, %v225_v10 }
  0x97   : > { %v257_v37 = vrot.slane %v254_v25, 4 }
  0x98   : > { %v238_v29 = vrot.slane %v235_v19, 4 }
  0x99   : > { %v258_v45 = vsel %vm239_vm0, %v253_v36, %v257_v37 }
  0x9a   : > { %v240_v41 = vsel %vm239_vm0, %v234_v38, %v238_v29 }
  0x9d   : > { %v215_v30 = vpop.permute.xlu0 %214  ;;  %v263_v33 = vpop.permute.xlu1 %262 }
  0x9e   : > { %v219_v32 = vperm.slane %v215_v30, %v218_v21  ;;  %v272_v39 = vmul.f32 %v270_v27, %v263_v33  ;;  %v271_v42 = vmul.f32 %v269_v31, %v263_v33 }
  0xa0   : > { %v221_v40 = vadd.f32 %v219_v32, %v209_v6  ;;  %v275_v43 = vrot.slane %v272_v39, 4 }
  0xa2   : > { %v242_v44 = vadd.f32 %v240_v41, %v221_v40  ;;  %v276_v49 = vsel %vm239_vm0, %v271_v42, %v275_v43 }
  0xa4   : > { %v260_v48 = vadd.f32 %v258_v45, %v242_v44 }
  0xa6   : > { %v278_v50 = vadd.f32 %v276_v49, %v260_v48 }
  0xa8   : > { %v296_v52 = vadd.f32 %v294_v51, %v278_v50 }
  0xaa   : > { %297 = vst [vmem:[%s206_s15] sm:$0xff] %v296_v52 }
  0xab   : > { %547 = shalt.err (!%p544_p13)
}
  0xac   : > { %420 = dma.vmem_to_hbm [thread:$0]  (%p680_p9), %s315_s6, 128, %s317_s7, %s299_s8  }
  0xad PF: > { %s328_s11 = sand.u32 1, %s582_s12   ;;  %p427_p0 = pnand %p404_p12, %p687_p11 }
  0xae   : > { %s329_s28 = scalar_lea.sflag [#allocation4], %s328_s11 }
  0xaf   : > { %p428_p1 = pneg %p427_p0 }
  0xb1   : > { %577 = dma.done.wait (%p428_p1), %s329_s28, 128  }
  0xb2   : > { %579 = vsyncadd (%p428_p1), %s329_s28, 4294967168  ;;  %s19_s17 = sadd.s32 1, %s602_s17   ;;  %s771_s12 = smov %s586_s13 }
  0xb3   : > { %p16_p2 = scmp.ge.s32.totalorder %s19_s17, 4   ;;  %s772_s13 = smov %s590_s14 }
  0xb4   : > { %s773_s14 = smov %s685_s26  ;;  %s774_s15 = smov %s598_s16 }
  0xb5   : > { %s775_s16 = smov %s777_s20  ;;  %18 = sbr.rel (!%p16_p2) target bundleno = 6 (0x6), region = 77 }
  0xba   :  { %335 = vsyncpa [#allocation3], 1 }
  0xbb   :  { %337 = vsyncpa [#allocation3 + $0x1], 1 }
  0xbc   :  { %338 = vsyncpa [#allocation4], 1 }
  0xbd   :  { %340 = vsyncpa [#allocation4 + $0x1], 1 }

</bundles_post_ra>
